<compile_context>
chip_gen: v7x
topology: tpu7x:2x2x1
jax: 0.10.0
libtpu: 0.0.40
codegen_flags: <defaults>
</compile_context>

<pallas_src>
import functools

import jax
import jax.numpy as jnp
import numpy as np
from jax.experimental import pallas as pl
from jax.experimental.pallas import tpu as pltpu

BN_EPS = 1e-5


def _fusion_kernel_split(xa_ref, xb_ref, w_ref, b_ref, o_ref):
    """Gate windows arrive as separate (TB, E) blocks (dead columns skipped)."""
    h = xa_ref[...] * xb_ref[...]
    y = jnp.dot(h, w_ref[...], preferred_element_type=jnp.float32)
    o_ref[...] = (y + b_ref[...]).astype(o_ref.dtype)


def _fusion_kernel_full(embed_dim, x1_ref, w_ref, b_ref, o_ref):
    """Full (TB, D_total) row block; gate slices taken in-register."""
    part_2 = x1_ref.shape[1] - embed_dim
    h = x1_ref[:, :embed_dim] * x1_ref[:, part_2:]
    y = jnp.dot(h, w_ref[...], preferred_element_type=jnp.float32)
    o_ref[...] = (y + b_ref[...]).astype(o_ref.dtype)


def _round_up(x, m):
    return ((x + m - 1) // m) * m


def fusion_forward(x1, w, b, gamma, beta, running_mean, running_var,
                   *, embed_dim, eps=BN_EPS):
    """Inference-mode FusionModel.forward.

    x1: (B, D_total);  w: (O, E) torch-Linear layout;  BN params are 1-D (O,).
    Returns (B, O) float32.
    """
    x1 = x1.astype(jnp.float32)
    B, d_total = x1.shape
    O, E = w.shape
    assert E == embed_dim
    part_2 = d_total - embed_dim

    # ---- host-side folding: BatchNorm(eval) + bias into the matmul -------------
    scale = gamma.astype(jnp.float32) * jax.lax.rsqrt(
        running_var.astype(jnp.float32) + eps)                           # (O,)
    w_fold = (w.astype(jnp.float32) * scale[:, None]).T                  # (E, O)
    b_fold = (b.astype(jnp.float32) - running_mean.astype(jnp.float32)) * scale \
        + beta.astype(jnp.float32)                                       # (O,)

    # ---- lane-dense output: pad O up to a multiple of 128 ----------------------
    O_pad = _round_up(max(O, 128), 128)
    if O_pad != O:
        w_fold = jnp.pad(w_fold, ((0, 0), (0, O_pad - O)))
        b_fold = jnp.pad(b_fold, (0, O_pad - O))
    b_row = b_fold.reshape(1, O_pad)

    # ---- column-window split of x1 (skip the unused middle columns) ------------
    split = (embed_dim % 128 == 0) and (part_2 > 0) and (part_2 % embed_dim == 0)
    in_cols = 2 * embed_dim if split else d_total

    # ---- batch tiling: biggest tile within a conservative VMEM budget ----------
    TB = min(_round_up(B, 8), 512)
    bytes_per_row = 4 * (in_cols + O_pad)
    while TB > 8 and 2 * TB * bytes_per_row > (8 << 20):   # 2x for double-buffering
        TB //= 2
    grid = (pl.cdiv(B, TB),)

    w_spec = pl.BlockSpec((embed_dim, O_pad), lambda i: (0, 0))   # resident
    b_spec = pl.BlockSpec((1, O_pad), lambda i: (0, 0))           # resident
    out_spec = pl.BlockSpec((TB, O_pad), lambda i: (i, 0))

    if split:
        kernel = _fusion_kernel_split
        xb_block = part_2 // embed_dim
        in_specs = [
            pl.BlockSpec((TB, embed_dim), lambda i: (i, 0)),
            pl.BlockSpec((TB, embed_dim), lambda i: (i, xb_block)),
            w_spec, b_spec,
        ]
        operands = (x1, x1, w_fold, b_row)
    else:
        kernel = functools.partial(_fusion_kernel_full, embed_dim)
        in_specs = [
            pl.BlockSpec((TB, d_total), lambda i: (i, 0)),
            w_spec, b_spec,
        ]
        operands = (x1, w_fold, b_row)

    cost = pl.CostEstimate(
        flops=2 * B * embed_dim * O_pad,
        transcendentals=0,
        bytes_accessed=4 * (B * in_cols + embed_dim * O_pad + O_pad + B * O_pad),
    )

    out_padded = pl.pallas_call(
        kernel,
        out_shape=jax.ShapeDtypeStruct((B, O_pad), jnp.float32),
        grid=grid,
        in_specs=in_specs,
        out_specs=out_spec,
        cost_estimate=cost,
        compiler_params=pltpu.CompilerParams(
            dimension_semantics=("parallel",),
            vmem_limit_bytes=32 * 1024 * 1024,
        ),
    )(*operands)

    # TODO(synk): training-mode dropout (torch RNG Bernoulli mask + 1/(1-p) scale) is
    # not reproduced; inference semantics only (identity).
    return out_padded[:, :O]


def _reference(x1, w, b, gamma, beta, mean, var, embed_dim, eps=BN_EPS):
    part_2 = x1.shape[1] - embed_dim
    h = x1[:, :embed_dim] * x1[:, part_2:]
    y = h @ w.T + b
    return (y - mean) / np.sqrt(var + eps) * gamma + beta


def _run_case(key, B, embed_dim, d_total, output_layer):
    k_x, k_w, k_b, k_g, k_be, k_m, k_v = jax.random.split(key, 7)
    x1 = jax.random.normal(k_x, (B, d_total), dtype=jnp.float32)

    bound = 1.0 / np.sqrt(embed_dim)
    w = jax.random.uniform(k_w, (output_layer, embed_dim),
                           minval=-bound, maxval=bound, dtype=jnp.float32)
    b = jax.random.uniform(k_b, (output_layer,),
                           minval=-bound, maxval=bound, dtype=jnp.float32)
    gamma = jax.random.uniform(k_g, (output_layer,),
                               minval=0.5, maxval=1.5, dtype=jnp.float32)
    beta = 0.1 * jax.random.normal(k_be, (output_layer,), dtype=jnp.float32)
    running_mean = 0.1 * jax.random.normal(k_m, (output_layer,), dtype=jnp.float32)
    running_var = jax.random.uniform(k_v, (output_layer,),
                                     minval=0.5, maxval=2.0, dtype=jnp.float32)

    out = fusion_forward(x1, w, b, gamma, beta, running_mean, running_var,
                         embed_dim=embed_dim)
    out = jax.block_until_ready(out)

    ref = _reference(np.asarray(x1), np.asarray(w), np.asarray(b),
                     np.asarray(gamma), np.asarray(beta),
                     np.asarray(running_mean), np.asarray(running_var), embed_dim)
    np.testing.assert_allclose(np.asarray(out), ref, rtol=5e-5, atol=5e-5)


if __name__ == "__main__":
    root = jax.random.PRNGKey(0)
    k1, k2 = jax.random.split(root)
    # case 1: non-lane-aligned embed_dim -> full-row-block path (in-kernel gate slices)
    _run_case(k1, B=8, embed_dim=32, d_total=96, output_layer=64)
    # case 2: lane-aligned embed_dim -> column-window split path (dead middle columns skipped)
    _run_case(k2, B=16, embed_dim=128, d_total=384, output_layer=128)
    print("KERNEL_OK")
</pallas_src>

<mosaic_0001>
module attributes {stable_mosaic.version = 11 : i64} {
  func.func @_fusion_kernel_full(%arg0: i32, %arg1: memref<8x96xf32, #tpu.memory_space<vmem>>, %arg2: memref<32x128xf32, #tpu.memory_space<vmem>>, %arg3: memref<1x128xf32, #tpu.memory_space<vmem>>, %arg4: memref<8x128xf32, #tpu.memory_space<vmem>>) attributes {dimension_semantics = [#tpu.dimension_semantics<parallel>], iteration_bounds = array<i64: 1>, scalar_prefetch = 0 : i64, scratch_operands = 0 : i64, tpu.core_type = #tpu.core_type<tc>, window_params = [{transform_indices = @transform_0, window_bounds = array<i64: 8, 96>}, {pipeline_mode = #tpu.pipeline_mode<synchronous>, transform_indices = @transform_1, window_bounds = array<i64: 32, 128>}, {pipeline_mode = #tpu.pipeline_mode<synchronous>, transform_indices = @transform_2, window_bounds = array<i64: 1, 128>}, {transform_indices = @transform_3, window_bounds = array<i64: 8, 128>}]} {
    %c0 = arith.constant 0 : index
    %c0_0 = arith.constant 0 : index
    %0 = vector.load %arg1[%c0, %c0_0] : memref<8x96xf32, #tpu.memory_space<vmem>>, vector<8x32xf32>
    %c0_1 = arith.constant 0 : index
    %c64 = arith.constant 64 : index
    %1 = vector.load %arg1[%c0_1, %c64] : memref<8x96xf32, #tpu.memory_space<vmem>>, vector<8x32xf32>
    %2 = arith.mulf %0, %1 : vector<8x32xf32>
    %c0_2 = arith.constant 0 : index
    %c0_3 = arith.constant 0 : index
    %3 = vector.load %arg2[%c0_2, %c0_3] : memref<32x128xf32, #tpu.memory_space<vmem>>, vector<32x128xf32>
    %cst = arith.constant dense<0.000000e+00> : vector<8x128xf32>
    %4 = tpu.matmul %2, %3, %cst {dimension_numbers = #tpu.dot_dimension_numbers<[1], [0], [0], [1], [0, 0, 1, 1], [], []>} : vector<8x32xf32>, vector<32x128xf32>, vector<8x128xf32> -> vector<8x128xf32>
    %c0_4 = arith.constant 0 : index
    %c0_5 = arith.constant 0 : index
    %5 = vector.load %arg3[%c0_4, %c0_5] : memref<1x128xf32, #tpu.memory_space<vmem>>, vector<1x128xf32>
    %6 = vector.broadcast %5 : vector<1x128xf32> to vector<8x128xf32>
    %7 = arith.addf %4, %6 : vector<8x128xf32>
    %c0_6 = arith.constant 0 : index
    %c0_7 = arith.constant 0 : index
    %8 = vector.load %arg4[%c0_6, %c0_7] : memref<8x128xf32, #tpu.memory_space<vmem>>, vector<8x128xf32>
    tpu.vector_store %arg4[%c0_6, %c0_7], %7 {strides = array<i32>} : memref<8x128xf32, #tpu.memory_space<vmem>>, vector<8x128xf32>,
    return
  }
  func.func @transform_0(%arg0: i32) -> (i32, i32) {
    %c0_i32 = arith.constant 0 : i32
    %c0_i32_0 = arith.constant 0 : i32
    return %arg0, %c0_i32 : i32, i32
  }
  func.func @transform_1(%arg0: i32) -> (i32, i32) {
    %c0_i32 = arith.constant 0 : i32
    %c0_i32_0 = arith.constant 0 : i32
    %c0_i32_1 = arith.constant 0 : i32
    return %c0_i32, %c0_i32_0 : i32, i32
  }
  func.func @transform_2(%arg0: i32) -> (i32, i32) {
    %c0_i32 = arith.constant 0 : i32
    %c0_i32_0 = arith.constant 0 : i32
    %c0_i32_1 = arith.constant 0 : i32
    return %c0_i32, %c0_i32_0 : i32, i32
  }
  func.func @transform_3(%arg0: i32) -> (i32, i32) {
    %c0_i32 = arith.constant 0 : i32
    %c0_i32_0 = arith.constant 0 : i32
    return %arg0, %c0_i32 : i32, i32
  }
}

</mosaic_0001>

<bundles_post_ra>
// kernel: tpu_custom_call.1
= control target key start
LH: loop header
LB: loop body
LE: loop exit
PB: predicated region body
PF: predicated region fallthrough
CT: control target
= control target key end

     0   :  { %8 = vsyncpa [#allocation3], 0  ;;  %s329_s0 = inlined_call_operand.hbm [shape: f32[8,96], index: 0, kind: input, shape index: {}]   ;;  %s330_s1 = inlined_call_operand.hbm [shape: f32[32,128], index: 1, kind: input, shape index: {}]   ;;  %s331_s2 = inlined_call_operand.vmem [shape: f32[1,128], index: 2, kind: input, shape index: {}]   ;;  %s332_s3 = inlined_call_operand.hbm [shape: f32[8,128], index: 3, kind: output, shape index: {}]  }
   0x1   :  { %9 = vsyncpa [#allocation6], 0 }
   0x2   :  { %10 = vsyncpa [#allocation4], 0  ;;  %s254_s12 = smov [#allocation2]   ;;  %s255_s14 = smov [#allocation5]  }
   0x3   :  { %s17_s13 = sshll.u32 %s254_s12, 4  ;;  %s26_s15 = sshll.u32 %s255_s14, 4  ;;  %s18_s13 = int_to_ptr.vmem [resolvable:$true] %s17_s13  ;;  %s283_s15 = int_to_ptr.vmem [resolvable:$true] %s26_s15 }
   0x4   :  { %s182_s18 = scalar_lea.hbm %s329_s0, 128 }
   0x5   :  { %p183_p0 = scmp.ne.s32.totalorder %s329_s0, %s182_s18  ;;  %p186_p1 = scmp.lt.u32.totalorder %s182_s18, %s329_s0 }
   0x7   :  { %p188_p2 = pnand %p186_p1, %p183_p0 }
   0x9   :  { %191 = shalt.err (!%p188_p2)
}
   0xa   :  { %s192_s23 = scalar_lea.vmem %s18_s13, 128  ;;  %p197_p4 = scmp.lt.s32.totalorder %s18_s13, %s18_s13 }
   0xb   :  { %p193_p3 = scmp.ne.s32.totalorder %s18_s13, %s192_s23  ;;  %p198_p5 = scmp.lt.s32.totalorder %s192_s23, %s192_s23 }
   0xd   :  { %p199_p6 = por %p198_p5, %p197_p4 }
   0xf   :  { %p200_p7 = pnand %p199_p6, %p193_p3 }
  0x11   :  { %203 = shalt.err (!%p200_p7)
}
  0x12   :  { %20 = dma.hbm_to_vmem [thread:$0]  %s329_s0, 128, %s18_s13, [#allocation3]  }
  0x13   :  { %s204_s28 = scalar_lea.hbm %s330_s1, 512 }
  0x14   :  { %p205_p8 = scmp.ne.s32.totalorder %s330_s1, %s204_s28  ;;  %p208_p9 = scmp.lt.u32.totalorder %s204_s28, %s330_s1 }
  0x16   :  { %p210_p10 = pnand %p208_p9, %p205_p8 }
  0x18   :  { %213 = shalt.err (!%p210_p10)
}
  0x19   :  { %s214_s6 = scalar_lea.vmem %s283_s15, 512  ;;  %p219_p12 = scmp.lt.s32.totalorder %s283_s15, %s283_s15 }
  0x1a   :  { %p215_p11 = scmp.ne.s32.totalorder %s283_s15, %s214_s6  ;;  %p220_p13 = scmp.lt.s32.totalorder %s214_s6, %s214_s6 }
  0x1c   :  { %p221_p0 = por %p220_p13, %p219_p12 }
  0x1e   :  { %p222_p1 = pnand %p221_p0, %p215_p11 }
  0x20   :  { %225 = shalt.err (!%p222_p1)
}
  0x21   :  { %s256_s0 = smov 128   ;;  %s257_s7 = smov 8  }
  0x22   :  { %32 = dma.hbm_to_vmem [thread:$0]  %s330_s1, 512, %s283_s15, [#allocation6], %s256_s0, %s256_s0, %s257_s7  }
  0x23   :  { %248 = dma.done.wait [#allocation3], 128  }
  0x24   :  { %249 = vsyncadd [#allocation3], 4294967168 }
  0x25   :  { %250 = dma.done.wait [#allocation6], 512  }
  0x26   :  { %251 = vsyncadd [#allocation6], 4294966784  ;;  %v258_v0 = vmov 0.0|0.0   ;;  %vm259_vm0 = vmmov 0   ;;  %v260_v1 = vmov 0.0   ;;  %v41_v2 = vld [vmem:[#allocation2] sm:$0xff] }
  0x27   :  { %167 = vmatprep.subr.bf16.mxu0 %v258_v0  ;;  %164 = vmatprep.mubr.msk.f32.mxu0 %vm259_vm0, %v260_v1  ;;  %v47_v3 = vld [vmem:[#allocation5] sm:$0xff]  ;;  %v48_v4 = vld [vmem:[#allocation5 + $0x8] sm:$0xff]  ;;  %s261_s10 = smov 64   ;;  %v49_v6 = vld [vmem:[#allocation5 + $0x10] sm:$0xff]  ;;  %vm58_vm1 = vcmask 261120   ;;  %s262_s12 = smov [#allocation7]  }
  0x28   :  { %43 = vrot.lane.b32.xlu0 %v41_v2, %s261_s10  ;;  %v168_v5 = vpack.c.bf16 %v48_v4, %v47_v3  ;;  %v50_v7 = vld [vmem:[#allocation5 + $0x18] sm:$0xff]  ;;  %s139_s13 = sshll.u32 %s262_s12, 4  ;;  %s140_s13 = int_to_ptr.vmem [resolvable:$true] %s139_s13 }
  0x29   :  { %v171_v8 = vpack.c.bf16 %v50_v7, %v49_v6  ;;  %v149_v11 = vld [vmem:[%s331_s2] ss:$0 sm:$0xff]  ;;  %s226_s14 = scalar_lea.vmem %s140_s13, 128  ;;  %p231_p3 = scmp.lt.s32.totalorder %s140_s13, %s140_s13 }
  0x2a   :  { %169 = vmatpush3.bf16.msra.mxu0 %v168_v5  ;;  %p227_p2 = scmp.ne.s32.totalorder %s140_s13, %s226_s14  ;;  %p232_p4 = scmp.lt.s32.totalorder %s226_s14, %s226_s14 }
  0x2b   :  { %170 = vmatprep.subr.bf16.mxu0 %v258_v0 }
  0x2c   :  { %p233_p5 = por %p232_p4, %p231_p3 }
  0x2e   :  { %172 = vmatpush3.bf16.msra.mxu0 %v171_v8  ;;  %p234_p6 = pnand %p233_p5, %p227_p2 }
  0x9a   :  { %v44_v9 = vpop.permute.xlu0 %43 }
  0x9b   :  { %v46_v10 = vmul.f32 %v44_v9, %v41_v2 }
  0x9d   :  { %165 = vmatmul.mubr.msk.f32.vlgmr.msra.gmra.mrb[0].mxu0 %vm58_vm1, %v46_v10 }
 0x170   :  { %v128_v12 = vpop.f32.mrb[0].mxu0 }
 0x171   :  { %v129_v13 = vadd.f32 %v149_v11, %v128_v12  ;;  %v166_v14 = vpop.f32.mrb[1].mxu0 }
 0x173   :  { %132 = vst [vmem:[#allocation7] sm:$0xff] %v129_v13 }
 0x174   :  { %237 = shalt.err (!%p234_p6)
}
 0x175   :  { %s238_s17 = scalar_lea.hbm %s332_s3, 128 }
 0x176   :  { %p239_p7 = scmp.ne.s32.totalorder %s332_s3, %s238_s17  ;;  %p242_p8 = scmp.lt.u32.totalorder %s238_s17, %s332_s3 }
 0x178   :  { %p244_p9 = pnand %p242_p8, %p239_p7 }
 0x17a   :  { %247 = shalt.err (!%p244_p9)
}
 0x17b   :  { %142 = dma.vmem_to_hbm [thread:$0]  %s140_s13, 128, %s332_s3, [#allocation4]  }
 0x17c   :  { %252 = dma.done.wait [#allocation4], 128  }
 0x17d   :  { %253 = vsyncadd [#allocation4], 4294967168 }
 0x17e   :  { %146 = vsyncpa [#allocation3], 1 }
 0x17f   :  { %147 = vsyncpa [#allocation6], 1 }
 0x180   :  { %148 = vsyncpa [#allocation4], 1 }

</bundles_post_ra>
